<compile_context>
chip_gen: v7x
topology: tpu7x:2x2x1
jax: 0.10.0
libtpu: 0.0.40
codegen_flags: <defaults>
</compile_context>

<pallas_src>
import math

import jax
import jax.numpy as jnp
from jax import lax
from jax.experimental import pallas as pl
from jax.experimental.pallas import tpu as pltpu


def _round_up(x, m):
    return ((x + m - 1) // m) * m


# ----------------------------------------------------------------------------
# Pallas kernels
# ----------------------------------------------------------------------------
def _linear_kernel(z_ref, w_ref, b_ref, o_ref):
    # init_hidden_states: single Linear(Z_dim, hidden_dim), no activation.
    o_ref[...] = (
        jnp.dot(z_ref[...], w_ref[...], preferred_element_type=jnp.float32)
        + b_ref[...]
    ).astype(o_ref.dtype)


def _ggen_step_kernel(x_ref, h_ref, wgx_ref, wgh_ref, bg_ref, wout_ref,
                      bout_ref, out_ref, hnew_ref):
    """One GRU step + output Linear.

    x_ref    : (B, I)      current input (no wrapper-side concat with h)
    h_ref    : (B, H)      hidden state
    wgx_ref  : (I, 4*GP)   input-side gate weights  [W_ir | W_iz | W_in | 0], lane-padded
    wgh_ref  : (GP, 4*GP)  hidden-side gate weights [W_hr | W_hz | 0 | W_hn], lane-padded
    bg_ref   : (1, 4*GP)   packed gate biases (r/z pre-summed), lane-padded
    wout_ref : (GP, OP)    output weights, zero-padded
    bout_ref : (1, OP)
    out_ref  : (B, OP)     lane-dense logits (wrapper slices to V+1)
    hnew_ref : (B, H)
    """
    H = hnew_ref.shape[-1]
    GP = bg_ref.shape[-1] // 4
    x = x_ref[...]
    h = h_ref[...]

    # Two row-block dots instead of a lane-shifting concat of [x, h].
    g = (jnp.dot(x, wgx_ref[...], preferred_element_type=jnp.float32)
         + jnp.dot(h, wgh_ref[0:H, :], preferred_element_type=jnp.float32)
         + bg_ref[...])

    r = jax.nn.sigmoid(g[:, 0:GP])            # full-vreg (128-lane) gate slices
    zg = jax.nn.sigmoid(g[:, GP:2 * GP])
    n = jnp.tanh(g[:, 2 * GP:3 * GP] + r * g[:, 3 * GP:4 * GP])

    h_new = (1.0 - zg[:, :H]) * n[:, :H] + zg[:, :H] * h
    hnew_ref[...] = h_new.astype(hnew_ref.dtype)
    out_ref[...] = (
        jnp.dot(h_new, wout_ref[0:H, :], preferred_element_type=jnp.float32)
        + bout_ref[...]
    ).astype(out_ref.dtype)


def _make_seq_kernel(*, Tc, T_total, GP, unroll):
    """Whole recurrence in one pallas_call: grid=(n_chunks,), time loop in-kernel.

    The init_hidden_states MLP is fused into chunk c == 0; the (lane-padded)
    hidden state is carried across grid steps in the VMEM scratch `h_sc`.
    """
    n_chunks = pl.cdiv(T_total, Tc)
    static_steps = (T_total % Tc == 0)

    def kernel(xs_ref, z_ref, wmlp_ref, bmlp_ref, wgx_ref, wgh_ref, bg_ref,
               wout_ref, bout_ref, outs_ref, hlast_ref, h_sc):
        c = pl.program_id(0)
        B = xs_ref.shape[1]
        OP = outs_ref.shape[-1]

        @pl.when(c == 0)
        def _():
            # hx = mlp(z): Linear(Z_dim, H), zero-padded to GP lanes (padding
            # columns stay exactly 0 for the whole recurrence).
            h_sc[...] = (
                jnp.dot(z_ref[...], wmlp_ref[...],
                        preferred_element_type=jnp.float32)
                + bmlp_ref[...])

        # Hoist loop-invariant weight loads and bias broadcasts above the loop.
        wgx = wgx_ref[...]
        wgh = wgh_ref[...]
        wout = wout_ref[...]
        bg = jnp.broadcast_to(bg_ref[...], (B, 4 * GP))
        bout = jnp.broadcast_to(bout_ref[...], (B, OP))

        def body(t, h):
            x = xs_ref[t]                                  # (B, I)
            g = (jnp.dot(x, wgx, preferred_element_type=jnp.float32)
                 + jnp.dot(h, wgh, preferred_element_type=jnp.float32)
                 + bg)
            r = jax.nn.sigmoid(g[:, 0:GP])
            zg = jax.nn.sigmoid(g[:, GP:2 * GP])
            n = jnp.tanh(g[:, 2 * GP:3 * GP] + r * g[:, 3 * GP:4 * GP])
            h_new = (1.0 - zg) * n + zg * h                # all (B, GP), full-vreg
            outs_ref[t] = (
                jnp.dot(h_new, wout, preferred_element_type=jnp.float32)
                + bout
            ).astype(outs_ref.dtype)
            return h_new

        h0 = h_sc[...]
        if static_steps:
            h_final = lax.fori_loop(0, Tc, body, h0, unroll=unroll)
        else:
            steps = jnp.minimum(Tc, T_total - c * Tc)      # partial last chunk
            h_final = lax.fori_loop(0, steps, body, h0)
        h_sc[...] = h_final

        @pl.when(c == n_chunks - 1)
        def _():
            hlast_ref[...] = h_final.astype(hlast_ref.dtype)

    return kernel, n_chunks


# ----------------------------------------------------------------------------
# Python wrapper
# ----------------------------------------------------------------------------
class GGeneratorPallas:
    """Deterministically-initialized Pallas version of GGenerator."""

    def __init__(self, input_size, hidden_dim=64, vocab_size=32, Z_dim=10,
                 seed=0):
        self.input_size = input_size
        self.hidden_dim = hidden_dim
        self.vocab_size = vocab_size
        self.Z_dim = Z_dim

        H, I, V1 = hidden_dim, input_size, vocab_size + 1
        GP = _round_up(H, 128)           # lane-padded gate / hidden width
        OP = _round_up(V1, 128)          # lane-dense logits width
        self.gate_pad = GP
        self.out_pad = OP

        key = jax.random.PRNGKey(seed)
        ks = jax.random.split(key, 8)
        su = 1.0 / math.sqrt(H)      # PyTorch bound for GRUCell / Linear(H,.)
        sz = 1.0 / math.sqrt(Z_dim)  # Linear(Z_dim, H)

        def u(k, shape, bound):
            return jax.random.uniform(k, shape, jnp.float32, -bound, bound)

        # GRUCell params, PyTorch layout: weight_ih (3H, I), weight_hh (3H, H).
        w_ih = u(ks[0], (3 * H, I), su)
        w_hh = u(ks[1], (3 * H, H), su)
        b_ih = u(ks[2], (3 * H,), su)
        b_hh = u(ks[3], (3 * H,), su)

        w_ir, w_iz, w_in = (w_ih[i * H:(i + 1) * H].T for i in range(3))  # (I,H)
        w_hr, w_hz, w_hn = (w_hh[i * H:(i + 1) * H].T for i in range(3))  # (H,H)
        b_ir, b_iz, b_in = (b_ih[i * H:(i + 1) * H] for i in range(3))
        b_hr, b_hz, b_hn = (b_hh[i * H:(i + 1) * H] for i in range(3))

        # Lane-padded packed gate weights, gate blocks [r | z | n_input | n_hidden],
        # each block GP=128 lanes wide (padding columns are zero).
        wgx = jnp.zeros((I, 4 * GP), jnp.float32)
        wgx = wgx.at[:, 0 * GP:0 * GP + H].set(w_ir)
        wgx = wgx.at[:, 1 * GP:1 * GP + H].set(w_iz)
        wgx = wgx.at[:, 2 * GP:2 * GP + H].set(w_in)
        self.w_gx = wgx

        wgh = jnp.zeros((GP, 4 * GP), jnp.float32)
        wgh = wgh.at[:H, 0 * GP:0 * GP + H].set(w_hr)
        wgh = wgh.at[:H, 1 * GP:1 * GP + H].set(w_hz)
        wgh = wgh.at[:H, 3 * GP:3 * GP + H].set(w_hn)
        self.w_gh = wgh

        bg = jnp.zeros((1, 4 * GP), jnp.float32)
        bg = bg.at[0, 0 * GP:0 * GP + H].set(b_ir + b_hr)   # r/z biases pre-summed
        bg = bg.at[0, 1 * GP:1 * GP + H].set(b_iz + b_hz)
        bg = bg.at[0, 2 * GP:2 * GP + H].set(b_in)          # n-gate biases stay split
        bg = bg.at[0, 3 * GP:3 * GP + H].set(b_hn)
        self.b_gate = bg

        # Output Linear(H, V+1), zero-padded to a lane-dense (GP, OP) slab.
        w_out = u(ks[4], (V1, H), su).T             # (H, V1)
        b_out = u(ks[5], (V1,), su)
        self.w_out_p = jnp.zeros((GP, OP), jnp.float32).at[:H, :V1].set(w_out)
        self.b_out_p = jnp.zeros((1, OP), jnp.float32).at[0, :V1].set(b_out)

        # init_hidden_states MLP: Linear(Z_dim, H), no activation.
        w_mlp = u(ks[6], (H, Z_dim), sz).T          # (Z, H)
        b_mlp = u(ks[7], (H,), sz)
        self.w_mlp = w_mlp
        self.b_mlp = b_mlp.reshape(1, H)
        self.w_mlp_p = jnp.zeros((Z_dim, GP), jnp.float32).at[:, :H].set(w_mlp)
        self.b_mlp_p = jnp.zeros((1, GP), jnp.float32).at[0, :H].set(b_mlp)

        # Unpacked copies kept only for the pure-JAX reference check.
        self.ref = dict(
            w_ir=w_ir, w_iz=w_iz, w_in=w_in, w_hr=w_hr, w_hz=w_hz, w_hn=w_hn,
            b_ir=b_ir, b_iz=b_iz, b_in=b_in, b_hr=b_hr, b_hz=b_hz, b_hn=b_hn,
            w_out=w_out, b_out=b_out.reshape(1, V1),
            w_mlp=w_mlp, b_mlp=self.b_mlp,
        )

    # -- init_hidden_states ---------------------------------------------------
    def init_hidden_states(self, z):
        B = z.shape[0]
        return pl.pallas_call(
            _linear_kernel,
            out_shape=jax.ShapeDtypeStruct((B, self.hidden_dim), jnp.float32),
        )(z, self.w_mlp, self.b_mlp)

    # -- forward: one GRU step + output Linear --------------------------------
    def __call__(self, x, hx):
        B = x.shape[0]
        V1 = self.vocab_size + 1
        out_p, h_new = pl.pallas_call(
            _ggen_step_kernel,
            out_shape=(
                jax.ShapeDtypeStruct((B, self.out_pad), jnp.float32),
                jax.ShapeDtypeStruct((B, self.hidden_dim), jnp.float32),
            ),
        )(x, hx, self.w_gx, self.w_gh, self.b_gate, self.w_out_p, self.b_out_p)
        return out_p[:, :V1], h_new

    # -- whole sequence in one kernel launch ----------------------------------
    def run_sequence(self, xs, z, *, max_chunk=None):
        """init_hidden_states(z) followed by the forward step for every xs[t].

        xs: (T, B, input_size), z: (B, Z_dim).
        Returns (outputs (T, B, V+1), final hidden state (B, H)).
        """
        T, B, I = xs.shape
        H, Z = self.hidden_dim, self.Z_dim
        GP, OP = self.gate_pad, self.out_pad
        V1 = self.vocab_size + 1

        # Time-chunk size: keep the per-chunk xs/outs slabs (double-buffered)
        # within a small VMEM budget; v7x (64 MiB VMEM, 32 MiB scoped) is the
        # binding case, and this stays far below it.
        per_step_bytes = 4 * B * (I + OP)
        budget_bytes = 4 << 20
        tc = max(1, min(T, budget_bytes // per_step_bytes, 512))
        if max_chunk is not None:
            tc = max(1, min(tc, int(max_chunk)))
        unroll = bool(tc <= 16)

        kernel, n_chunks = _make_seq_kernel(Tc=tc, T_total=T, GP=GP,
                                            unroll=unroll)

        grid_spec = pltpu.PrefetchScalarGridSpec(
            num_scalar_prefetch=0,
            grid=(n_chunks,),
            in_specs=[
                pl.BlockSpec((tc, B, I), lambda c: (c, 0, 0)),     # xs chunk
                pl.BlockSpec((B, Z), lambda c: (0, 0)),            # z (resident)
                pl.BlockSpec((Z, GP), lambda c: (0, 0)),           # w_mlp (padded)
                pl.BlockSpec((1, GP), lambda c: (0, 0)),           # b_mlp (padded)
                pl.BlockSpec((I, 4 * GP), lambda c: (0, 0)),       # w_gx
                pl.BlockSpec((GP, 4 * GP), lambda c: (0, 0)),      # w_gh
                pl.BlockSpec((1, 4 * GP), lambda c: (0, 0)),       # b_gate
                pl.BlockSpec((GP, OP), lambda c: (0, 0)),          # w_out
                pl.BlockSpec((1, OP), lambda c: (0, 0)),           # b_out
            ],
            out_specs=(
                pl.BlockSpec((tc, B, OP), lambda c: (c, 0, 0)),    # logits chunk
                pl.BlockSpec((B, GP), lambda c: (0, 0)),           # final h (padded)
            ),
            scratch_shapes=[pltpu.VMEM((B, GP), jnp.float32)],     # carried h
        )

        outs_p, h_last_p = pl.pallas_call(
            kernel,
            out_shape=(
                jax.ShapeDtypeStruct((T, B, OP), jnp.float32),
                jax.ShapeDtypeStruct((B, GP), jnp.float32),
            ),
            grid_spec=grid_spec,
            compiler_params=pltpu.CompilerParams(
                dimension_semantics=("arbitrary",)),   # loop-carried recurrence
        )(xs, z, self.w_mlp_p, self.b_mlp_p, self.w_gx, self.w_gh,
          self.b_gate, self.w_out_p, self.b_out_p)

        return outs_p[:, :, :V1], h_last_p[:, :H]


# ----------------------------------------------------------------------------
# Pure-JAX reference (independent math path, unpacked weights)
# ----------------------------------------------------------------------------
def _reference_forward(m: GGeneratorPallas, x, hx):
    p = m.ref
    r = jax.nn.sigmoid(x @ p['w_ir'] + p['b_ir'] + hx @ p['w_hr'] + p['b_hr'])
    z = jax.nn.sigmoid(x @ p['w_iz'] + p['b_iz'] + hx @ p['w_hz'] + p['b_hz'])
    n = jnp.tanh(x @ p['w_in'] + p['b_in'] + r * (hx @ p['w_hn'] + p['b_hn']))
    h_new = (1.0 - z) * n + z * hx
    out = h_new @ p['w_out'] + p['b_out']
    return out, h_new


def _reference_sequence(m: GGeneratorPallas, xs, z):
    hx = z @ m.ref['w_mlp'] + m.ref['b_mlp']
    outs = []
    for t in range(xs.shape[0]):
        out, hx = _reference_forward(m, xs[t], hx)
        outs.append(out)
    return jnp.stack(outs, axis=0), hx


if __name__ == "__main__":
    # Small shapes consistent with the module.
    B = 8
    T = 4
    INPUT_SIZE = 16
    HIDDEN = 32
    VOCAB = 32
    Z_DIM = 10

    model = GGeneratorPallas(INPUT_SIZE, hidden_dim=HIDDEN,
                             vocab_size=VOCAB, Z_dim=Z_DIM, seed=0)

    key = jax.random.PRNGKey(0)
    kx, kz, ks, ks2 = jax.random.split(key, 4)
    x = jax.random.normal(kx, (B, INPUT_SIZE), jnp.float32)
    z = jax.random.normal(kz, (B, Z_DIM), jnp.float32)
    xs = jax.random.normal(ks, (T, B, INPUT_SIZE), jnp.float32)

    # Single-step path (matches the module API: init_hidden_states + forward).
    hx = model.init_hidden_states(z)
    out, h_new = model(x, hx)
    jax.block_until_ready((hx, out, h_new))

    ref_hx = z @ model.ref['w_mlp'] + model.ref['b_mlp']
    ref_out, ref_h = _reference_forward(model, x, ref_hx)
    assert out.shape == (B, VOCAB + 1) and h_new.shape == (B, HIDDEN)
    assert jnp.allclose(hx, ref_hx, atol=2e-4, rtol=2e-4)
    assert jnp.allclose(out, ref_out, atol=2e-4, rtol=2e-4)
    assert jnp.allclose(h_new, ref_h, atol=2e-4, rtol=2e-4)

    # Fused sequence path: one launch for init + all recurrent steps.
    outs, h_last = model.run_sequence(xs, z)
    jax.block_until_ready((outs, h_last))

    ref_outs, ref_hlast = _reference_sequence(model, xs, z)
    assert outs.shape == (T, B, VOCAB + 1) and h_last.shape == (B, HIDDEN)
    assert jnp.allclose(outs, ref_outs, atol=2e-4, rtol=2e-4)
    assert jnp.allclose(h_last, ref_hlast, atol=2e-4, rtol=2e-4)

    # Chunked path with a partial last chunk (T=6, chunk=4 -> 2 chunks).
    T2 = 6
    xs2 = jax.random.normal(ks2, (T2, B, INPUT_SIZE), jnp.float32)
    outs2, h_last2 = model.run_sequence(xs2, z, max_chunk=4)
    jax.block_until_ready((outs2, h_last2))
    ref_outs2, ref_hlast2 = _reference_sequence(model, xs2, z)
    assert outs2.shape == (T2, B, VOCAB + 1) and h_last2.shape == (B, HIDDEN)
    assert jnp.allclose(outs2, ref_outs2, atol=2e-4, rtol=2e-4)
    assert jnp.allclose(h_last2, ref_hlast2, atol=2e-4, rtol=2e-4)

    print("KERNEL_OK")
</pallas_src>

<mosaic_0001>
module attributes {stable_mosaic.version = 11 : i64} {
  func.func @_linear_kernel(%arg0: memref<8x10xf32, #tpu.memory_space<vmem>>, %arg1: memref<10x32xf32, #tpu.memory_space<vmem>>, %arg2: memref<1x32xf32, #tpu.memory_space<vmem>>, %arg3: memref<8x32xf32, #tpu.memory_space<vmem>>) attributes {dimension_semantics = [], scalar_prefetch = 0 : i64, scratch_operands = 0 : i64, tpu.core_type = #tpu.core_type<tc>} {
    %c0 = arith.constant 0 : index
    %c0_0 = arith.constant 0 : index
    %0 = vector.load %arg0[%c0, %c0_0] : memref<8x10xf32, #tpu.memory_space<vmem>>, vector<8x10xf32>
    %c0_1 = arith.constant 0 : index
    %c0_2 = arith.constant 0 : index
    %1 = vector.load %arg1[%c0_1, %c0_2] : memref<10x32xf32, #tpu.memory_space<vmem>>, vector<10x32xf32>
    %cst = arith.constant dense<0.000000e+00> : vector<8x32xf32>
    %2 = tpu.matmul %0, %1, %cst {dimension_numbers = #tpu.dot_dimension_numbers<[1], [0], [0], [1], [0, 0, 1, 1], [], []>} : vector<8x10xf32>, vector<10x32xf32>, vector<8x32xf32> -> vector<8x32xf32>
    %c0_3 = arith.constant 0 : index
    %c0_4 = arith.constant 0 : index
    %3 = vector.load %arg2[%c0_3, %c0_4] : memref<1x32xf32, #tpu.memory_space<vmem>>, vector<1x32xf32>
    %4 = vector.broadcast %3 : vector<1x32xf32> to vector<8x32xf32>
    %5 = arith.addf %2, %4 : vector<8x32xf32>
    %c0_5 = arith.constant 0 : index
    %c0_6 = arith.constant 0 : index
    %6 = vector.load %arg3[%c0_5, %c0_6] : memref<8x32xf32, #tpu.memory_space<vmem>>, vector<8x32xf32>
    tpu.vector_store %arg3[%c0_5, %c0_6], %5 {strides = array<i32>} : memref<8x32xf32, #tpu.memory_space<vmem>>, vector<8x32xf32>,
    return
  }
}

</mosaic_0001>

<bundles_post_ra>
// kernel: tpu_custom_call.1
= control target key start
LH: loop header
LB: loop body
LE: loop exit
PB: predicated region body
PF: predicated region fallthrough
CT: control target
= control target key end

     0   :  { %8 = vsyncpa [#allocation3], 0  ;;  %s320_s0 = inlined_call_operand.hbm [shape: f32[8,10], index: 0, kind: input, shape index: {}]   ;;  %s321_s1 = inlined_call_operand.hbm [shape: f32[10,32], index: 1, kind: input, shape index: {}]   ;;  %s322_s2 = inlined_call_operand.vmem [shape: f32[1,32], index: 2, kind: input, shape index: {}]   ;;  %s323_s3 = inlined_call_operand.hbm [shape: f32[8,32], index: 3, kind: output, shape index: {}]  }
   0x1   :  { %9 = vsyncpa [#allocation6], 0 }
   0x2   :  { %10 = vsyncpa [#allocation4], 0  ;;  %s245_s12 = smov [#allocation2]   ;;  %s246_s14 = smov [#allocation5]  }
   0x3   :  { %s17_s13 = sshll.u32 %s245_s12, 4  ;;  %s26_s15 = sshll.u32 %s246_s14, 4  ;;  %s18_s13 = int_to_ptr.vmem [resolvable:$true] %s17_s13  ;;  %s274_s15 = int_to_ptr.vmem [resolvable:$true] %s26_s15 }
   0x4   :  { %s173_s18 = scalar_lea.hbm %s320_s0, 128 }
   0x5   :  { %p174_p0 = scmp.ne.s32.totalorder %s320_s0, %s173_s18  ;;  %p177_p1 = scmp.lt.u32.totalorder %s173_s18, %s320_s0 }
   0x7   :  { %p179_p2 = pnand %p177_p1, %p174_p0 }
   0x9   :  { %182 = shalt.err (!%p179_p2)
}
   0xa   :  { %s183_s23 = scalar_lea.vmem %s18_s13, 128  ;;  %p188_p4 = scmp.lt.s32.totalorder %s18_s13, %s18_s13 }
   0xb   :  { %p184_p3 = scmp.ne.s32.totalorder %s18_s13, %s183_s23  ;;  %p189_p5 = scmp.lt.s32.totalorder %s183_s23, %s183_s23 }
   0xd   :  { %p190_p6 = por %p189_p5, %p188_p4 }
   0xf   :  { %p191_p7 = pnand %p190_p6, %p184_p3 }
  0x11   :  { %194 = shalt.err (!%p191_p7)
}
  0x12   :  { %20 = dma.hbm_to_vmem [thread:$0]  %s320_s0, 128, %s18_s13, [#allocation3]  }
  0x13   :  { %s195_s28 = scalar_lea.hbm %s321_s1, 256 }
  0x14   :  { %p196_p8 = scmp.ne.s32.totalorder %s321_s1, %s195_s28  ;;  %p199_p9 = scmp.lt.u32.totalorder %s195_s28, %s321_s1 }
  0x16   :  { %p201_p10 = pnand %p199_p9, %p196_p8 }
  0x18   :  { %204 = shalt.err (!%p201_p10)
}
  0x19   :  { %s205_s6 = scalar_lea.vmem %s274_s15, 256  ;;  %p210_p12 = scmp.lt.s32.totalorder %s274_s15, %s274_s15 }
  0x1a   :  { %p206_p11 = scmp.ne.s32.totalorder %s274_s15, %s205_s6  ;;  %p211_p13 = scmp.lt.s32.totalorder %s205_s6, %s205_s6 }
  0x1c   :  { %p212_p0 = por %p211_p13, %p210_p12 }
  0x1e   :  { %p213_p1 = pnand %p212_p0, %p206_p11 }
  0x20   :  { %216 = shalt.err (!%p213_p1)
}
  0x21   :  { %s247_s0 = smov 128   ;;  %s248_s7 = smov 8  }
  0x22   :  { %32 = dma.hbm_to_vmem [thread:$0]  %s321_s1, 256, %s274_s15, [#allocation6], %s247_s0, %s247_s0, %s248_s7  }
  0x23   :  { %239 = dma.done.wait [#allocation3], 128  }
  0x24   :  { %240 = vsyncadd [#allocation3], 4294967168 }
  0x25   :  { %241 = dma.done.wait [#allocation6], 256  }
  0x26   :  { %242 = vsyncadd [#allocation6], 4294967040  ;;  %v249_v0 = vmov 0.0|0.0   ;;  %vm250_vm0 = vmmov 0   ;;  %v251_v1 = vmov 0.0   ;;  %vm55_vm1 = vcmask 1041408  }
  0x27   :  { %160 = vmatprep.subr.bf16.mxu0 %v249_v0  ;;  %157 = vmatprep.mubr.msk.f32.mxu0 %vm250_vm0, %v251_v1  ;;  %v42_v2 = vld [vmem:[#allocation5] sm:$0xff]  ;;  %v43_v3 = vld [vmem:[#allocation5 + $0x8] sm:$0x3]  ;;  %vm252_vm2 = vmmov 1   ;;  %v41_v5 = vld [vmem:[#allocation2] sm:$0xff]  ;;  %vm51_vm4 = vcmask 80896  }
  0x28   :  { %vm162_vm3 = vmpackc.low %vm55_vm1, %vm252_vm2  ;;  %v161_v4 = vpack.c.bf16 %v43_v3, %v42_v2  ;;  %v147_v6 = vld [vmem:[%s322_s2] ss:$0 sm:$0xff]  ;;  %s253_s11 = smov [#allocation7]   ;;  %vm129_vm5 = vcmask 261120  }
  0x29   :  { %s137_s12 = sshll.u32 %s253_s11, 4  ;;  %s138_s12 = int_to_ptr.vmem [resolvable:$true] %s137_s12 }
  0x2a   :  { %163 = vmatpush3.bf16.msk.msra.mxu0 %vm162_vm3, %v161_v4  ;;  %s217_s13 = scalar_lea.vmem %s138_s12, 128  ;;  %p222_p3 = scmp.lt.s32.totalorder %s138_s12, %s138_s12 }
  0x2b   :  { %p218_p2 = scmp.ne.s32.totalorder %s138_s12, %s217_s13  ;;  %p223_p4 = scmp.lt.s32.totalorder %s217_s13, %s217_s13 }
  0x2d   :  { %158 = vmatmul.mubr.msk.f32.vlgmr.msra.gmra.mrb[0].mxu0 %vm51_vm4, %v41_v5  ;;  %p224_p5 = por %p223_p4, %p222_p3 }
  0x2f   :  { %p225_p6 = pnand %p224_p5, %p218_p2 }
 0x100   :  { %v125_v7 = vpop.f32.mrb[0].mxu0 }
 0x101   :  { %v126_v8 = vadd.f32 %v147_v6, %v125_v7  ;;  %v159_v9 = vpop.f32.mrb[1].mxu0 }
 0x103   :  { %130 = vst.msk [vmem:[#allocation7] sm:$0xff] %vm129_vm5, %v126_v8 }
 0x104   :  { %228 = shalt.err (!%p225_p6)
}
 0x105   :  { %s229_s16 = scalar_lea.hbm %s323_s3, 128 }
 0x106   :  { %p230_p7 = scmp.ne.s32.totalorder %s323_s3, %s229_s16  ;;  %p233_p8 = scmp.lt.u32.totalorder %s229_s16, %s323_s3 }
 0x108   :  { %p235_p9 = pnand %p233_p8, %p230_p7 }
 0x10a   :  { %238 = shalt.err (!%p235_p9)
}
 0x10b   :  { %140 = dma.vmem_to_hbm [thread:$0]  %s138_s12, 128, %s323_s3, [#allocation4]  }
 0x10c   :  { %243 = dma.done.wait [#allocation4], 128  }
 0x10d   :  { %244 = vsyncadd [#allocation4], 4294967168 }
 0x10e   :  { %144 = vsyncpa [#allocation3], 1 }
 0x10f   :  { %145 = vsyncpa [#allocation6], 1 }
 0x110   :  { %146 = vsyncpa [#allocation4], 1 }

</bundles_post_ra>
